<compile_context>
chip_gen: v7x
topology: tpu7x:2x2x1
jax: 0.10.0
libtpu: 0.0.40
codegen_flags: <defaults>
</compile_context>

<pallas_src>
import functools

import jax
import jax.numpy as jnp
from jax import lax
from jax.experimental import pallas as pl
from jax.experimental.pallas import tpu as pltpu

C = 2048          # backbone output channels (fixed by nn.Linear(2048, ...))
H = W = 7         # backbone spatial size
HW = H * W
MAX_BT = 8        # batch rows per grid step.
                  # bf16 x tile per buffer: NHWC  8 * 64sub * 2048 * 2B = 2 MiB
                  #                         NCHW  8 * 2048 * 128lane * 2B = 4 MiB
                  # => <= 8 MiB double-buffered, well inside the 32 MiB limit below.
VMEM_LIMIT = 32 * 1024 * 1024


def _pick_bt(batch):
    """Largest divisor of `batch` <= MAX_BT, capped so the grid has >= 2 steps
    whenever batch >= 2 (feeds both v7x TensorCores via the parallel axis).
    Choosing a divisor means no jnp.pad / extra HBM pass on the features."""
    target = min(MAX_BT, batch)
    if batch >= 2:
        target = min(target, -(-batch // 2))
    for cand in range(target, 0, -1):
        if batch % cand == 0:
            return cand
    return 1


# ---------------------------------------------------------------------------
# Kernels — lane-dense (NHWC -> (B, HW, C)) variants
# ---------------------------------------------------------------------------
def _cam_kernel_hwc(x_ref, wt_ref, b_ref, logits_ref, hm_ref, *, bt):
    """eac / lnsu head on lane-dense features.

    x_ref  : (bt, HW, C)  bf16 backbone features, C on the lane axis
    wt_ref : (C, K)       bf16 fc weight (transposed once in the wrapper, tiny)
    b_ref  : (1, K)       f32 fc bias
    hm_ref : (bt, HW, K)  f32 class-activation map (transposed to (B,K,H,W) in wrapper)
    """
    for i in range(bt):
        # (HW, C) @ (C, K) -> (HW, K), bf16 MXU with f32 accumulation.
        hm_ref[i] = lax.dot_general(
            x_ref[i], wt_ref[...],
            dimension_numbers=(((1,), (0,)), ((), ())),
            preferred_element_type=jnp.float32)
    # fc(avg_pool(x)) == avg_pool_hw(hm) + bias  -> reuse the CAM, no 2nd matmul.
    logits_ref[...] = jnp.mean(hm_ref[...], axis=1) + b_ref[...]


def _pool_fc_kernel_hwc(x_ref, wt_ref, b_ref, *out_refs, k, with_alpha):
    """baseline / scn head on lane-dense features: AdaptiveAvgPool2d -> Linear (-> gate).

    x_ref  : (bt, HW, C) bf16
    wt_ref : (C, K) bf16 for baseline, (C, K+1) bf16 for scn (fc cols + alpha col)
    b_ref  : (1, K) / (1, K+1) f32
    """
    # Mean over HW is a sublane-axis reduce here (cheap VPU adds), done in f32.
    feat = jnp.mean(x_ref[...].astype(jnp.float32), axis=1)          # (bt, C)
    z = lax.dot_general(
        feat, wt_ref[...].astype(jnp.float32),
        dimension_numbers=(((1,), (0,)), ((), ())),
        preferred_element_type=jnp.float32) + b_ref[...]              # (bt, K[+1])
    if with_alpha:                                                    # scn trainer
        attn_ref, scn_ref = out_refs
        attn = jax.nn.sigmoid(z[:, k:k + 1])                          # (bt, 1)
        attn_ref[...] = attn
        scn_ref[...] = attn * z[:, :k]                                # (bt, K)
    else:                                                             # baseline
        (logits_ref,) = out_refs
        logits_ref[...] = z


# ---------------------------------------------------------------------------
# Kernels — channels-major (NCHW -> (B, C, HW)) variants (no wrapper transpose)
# ---------------------------------------------------------------------------
def _cam_kernel_chw(x_ref, w_ref, b_ref, logits_ref, hm_ref, *, bt):
    """eac / lnsu head on NCHW-flattened features.

    x_ref : (bt, C, HW) bf16,  w_ref : (K, C) bf16,  b_ref : (1, K) f32
    hm_ref: (bt, K, HW) f32
    """
    for i in range(bt):
        hm_ref[i] = lax.dot_general(
            w_ref[...], x_ref[i],
            dimension_numbers=(((1,), (0,)), ((), ())),
            preferred_element_type=jnp.float32)
    logits_ref[...] = jnp.mean(hm_ref[...], axis=2) + b_ref[...]


def _pool_fc_kernel_chw(x_ref, w_ref, b_ref, *out_refs, k, with_alpha):
    """baseline / scn head on NCHW-flattened features.

    x_ref : (bt, C, HW) bf16,  w_ref : (K[+1], C) bf16,  b_ref : (1, K[+1]) f32
    """
    # Lane-axis reduce (XLU); secondary path, kernel is DMA-bound anyway.
    feat = jnp.mean(x_ref[...].astype(jnp.float32), axis=2)          # (bt, C)
    z = lax.dot_general(
        feat, w_ref[...].astype(jnp.float32),
        dimension_numbers=(((1,), (1,)), ((), ())),                  # feat @ W^T
        preferred_element_type=jnp.float32) + b_ref[...]
    if with_alpha:
        attn_ref, scn_ref = out_refs
        attn = jax.nn.sigmoid(z[:, k:k + 1])
        attn_ref[...] = attn
        scn_ref[...] = attn * z[:, :k]
    else:
        (logits_ref,) = out_refs
        logits_ref[...] = z


# ---------------------------------------------------------------------------
# Wrapper
# ---------------------------------------------------------------------------
def resnet_head_forward(x_feat, params, trainer="lnsu", layout=None):
    """Classifier heads of `Model`.

    x_feat : backbone features, either NCHW (B, 2048, 7, 7) — PyTorch layout —
             or NHWC (B, 7, 7, 2048) — preferred lane-dense TPU layout.
             Ideally supplied in bf16 already (the cast here is then free).
    """
    if layout is None:
        if x_feat.ndim == 4 and x_feat.shape[-1] == C:
            layout = "NHWC"
        elif x_feat.ndim == 4 and x_feat.shape[1] == C:
            layout = "NCHW"
        else:
            raise ValueError(f"cannot infer layout from shape {x_feat.shape}")
    hwc = layout == "NHWC"

    if hwc:
        B, h, w, c = x_feat.shape
    else:
        B, c, h, w = x_feat.shape
    assert (c, h, w) == (C, H, W)
    hw = h * w
    K = params["w_fc"].shape[0]

    # bf16 features: halves HBM traffic on the dominant tensor (no-op if the
    # backbone already emits bf16).  Reshape to 3-D is free (pure collapse).
    x = x_feat.astype(jnp.bfloat16)
    x = x.reshape(B, hw, c) if hwc else x.reshape(B, c, hw)

    bt = _pick_bt(B)                    # divisor of B -> no padding pass
    grid = (B // bt,)
    G = grid[0]

    if hwc:
        x_spec = pl.BlockSpec((bt, hw, c), lambda b: (b, 0, 0))
    else:
        x_spec = pl.BlockSpec((bt, c, hw), lambda b: (b, 0, 0))

    cparams = pltpu.CompilerParams(
        dimension_semantics=("parallel",),
        vmem_limit_bytes=VMEM_LIMIT)

    # ------------------------------------------------------------- eac / lnsu
    if trainer in ("eac", "lnsu"):
        w_fc = params["w_fc"].astype(jnp.bfloat16)                   # (K, C)
        b_fc = params["b_fc"].astype(jnp.float32).reshape(1, K)
        w_arg = w_fc.T if hwc else w_fc                               # tiny transpose
        hm_shape = (B, hw, K) if hwc else (B, K, hw)
        hm_spec = (pl.BlockSpec((bt, hw, K), lambda b: (b, 0, 0)) if hwc
                   else pl.BlockSpec((bt, K, hw), lambda b: (b, 0, 0)))
        kern = _cam_kernel_hwc if hwc else _cam_kernel_chw
        cost = pl.CostEstimate(
            flops=2 * B * K * c * hw,
            transcendentals=0,
            bytes_accessed=(B * c * hw + K * c) * 2
                           + (B * K * hw + B * K + K) * 4)
        logits, hm = pl.pallas_call(
            functools.partial(kern, bt=bt),
            grid_spec=pltpu.PrefetchScalarGridSpec(
                num_scalar_prefetch=0,
                grid=grid,
                in_specs=[x_spec,
                          pl.BlockSpec(w_arg.shape, lambda b: (0, 0)),
                          pl.BlockSpec((1, K), lambda b: (0, 0))],
                out_specs=[pl.BlockSpec((None, bt, K), lambda b: (b, 0, 0)),
                           hm_spec]),
            out_shape=(jax.ShapeDtypeStruct((G, bt, K), jnp.float32),
                       jax.ShapeDtypeStruct(hm_shape, jnp.float32)),
            compiler_params=cparams,
            cost_estimate=cost,
        )(x, w_arg, b_fc)
        logits = logits.reshape(B, K)
        if hwc:
            hm = jnp.transpose(hm, (0, 2, 1))   # tiny (~1.4 KB/row) output fix-up
        return logits, hm.reshape(B, K, h, w)

    # --------------------------------------------------------------------- scn
    if trainer == "scn":
        kp = K + 1
        # Fold the alpha head into the fc weight -> one contraction per block.
        w_cat = jnp.concatenate(
            [params["w_fc"], params["w_alpha"]], axis=0).astype(jnp.bfloat16)  # (K+1, C)
        b_cat = jnp.concatenate(
            [params["b_fc"], params["b_alpha"]]).astype(jnp.float32).reshape(1, kp)
        w_arg = w_cat.T if hwc else w_cat
        kern = _pool_fc_kernel_hwc if hwc else _pool_fc_kernel_chw
        cost = pl.CostEstimate(
            flops=B * c * hw + 2 * B * kp * c,
            transcendentals=B,
            bytes_accessed=(B * c * hw + kp * c) * 2 + (kp + B * (K + 1)) * 4)
        attn, scn_out = pl.pallas_call(
            functools.partial(kern, k=K, with_alpha=True),
            grid_spec=pltpu.PrefetchScalarGridSpec(
                num_scalar_prefetch=0,
                grid=grid,
                in_specs=[x_spec,
                          pl.BlockSpec(w_arg.shape, lambda b: (0, 0)),
                          pl.BlockSpec((1, kp), lambda b: (0, 0))],
                out_specs=[pl.BlockSpec((None, bt, 1), lambda b: (b, 0, 0)),
                           pl.BlockSpec((None, bt, K), lambda b: (b, 0, 0))]),
            out_shape=(jax.ShapeDtypeStruct((G, bt, 1), jnp.float32),
                       jax.ShapeDtypeStruct((G, bt, K), jnp.float32)),
            compiler_params=cparams,
            cost_estimate=cost,
        )(x, w_arg, b_cat)
        return attn.reshape(B, 1), scn_out.reshape(B, K)

    # --------------------------------------------------- baseline (and default)
    w_fc = params["w_fc"].astype(jnp.bfloat16)
    b_fc = params["b_fc"].astype(jnp.float32).reshape(1, K)
    w_arg = w_fc.T if hwc else w_fc
    kern = _pool_fc_kernel_hwc if hwc else _pool_fc_kernel_chw
    cost = pl.CostEstimate(
        flops=B * c * hw + 2 * B * K * c,
        transcendentals=0,
        bytes_accessed=(B * c * hw + K * c) * 2 + (K + B * K) * 4)
    logits = pl.pallas_call(
        functools.partial(kern, k=K, with_alpha=False),
        grid_spec=pltpu.PrefetchScalarGridSpec(
            num_scalar_prefetch=0,
            grid=grid,
            in_specs=[x_spec,
                      pl.BlockSpec(w_arg.shape, lambda b: (0, 0)),
                      pl.BlockSpec((1, K), lambda b: (0, 0))],
            out_specs=pl.BlockSpec((None, bt, K), lambda b: (b, 0, 0))),
        out_shape=jax.ShapeDtypeStruct((G, bt, K), jnp.float32),
        compiler_params=cparams,
        cost_estimate=cost,
    )(x, w_arg, b_fc)
    return logits.reshape(B, K)


# ---------------------------------------------------------------------------
# Self-test
# ---------------------------------------------------------------------------
if __name__ == "__main__":
    B = 2
    NUM_CLASSES = 7

    key = jax.random.PRNGKey(0)
    k_x, k_wfc, k_bfc, k_wa, k_ba = jax.random.split(key, 5)

    # Deterministic stand-in for the backbone output, in both layouts.
    x_nchw = jax.random.normal(k_x, (B, C, H, W), dtype=jnp.float32)
    x_nhwc = jnp.transpose(x_nchw, (0, 2, 3, 1))   # test-only transpose

    params = {
        "w_fc": 0.02 * jax.random.normal(k_wfc, (NUM_CLASSES, C), jnp.float32),
        "b_fc": 0.01 * jax.random.normal(k_bfc, (NUM_CLASSES,), jnp.float32),
        "w_alpha": 0.02 * jax.random.normal(k_wa, (1, C), jnp.float32),
        "b_alpha": 0.01 * jax.random.normal(k_ba, (1,), jnp.float32),
    }

    # Every head, both feature layouts.
    logits_l, hm_l = resnet_head_forward(x_nhwc, params, trainer="lnsu")
    logits_l2, hm_l2 = resnet_head_forward(x_nchw, params, trainer="lnsu")
    attn_s, scn_s = resnet_head_forward(x_nhwc, params, trainer="scn")
    attn_s2, scn_s2 = resnet_head_forward(x_nchw, params, trainer="scn")
    logits_b = resnet_head_forward(x_nhwc, params, trainer="baseline")
    logits_b2 = resnet_head_forward(x_nchw, params, trainer="baseline")
    jax.block_until_ready((logits_l, hm_l, logits_l2, hm_l2, attn_s, scn_s,
                           attn_s2, scn_s2, logits_b, logits_b2))

    # Plain-JAX reference on the same bf16-quantized inputs the kernels consume.
    xq = x_nchw.astype(jnp.bfloat16).astype(jnp.float32)
    wq = params["w_fc"].astype(jnp.bfloat16).astype(jnp.float32)
    waq = params["w_alpha"].astype(jnp.bfloat16).astype(jnp.float32)
    feat_ref = xq.mean(axis=(2, 3))                                    # (B, C)
    logits_ref = feat_ref @ wq.T + params["b_fc"]                      # (B, K)
    attn_ref = jax.nn.sigmoid(feat_ref @ waq.T + params["b_alpha"])
    scn_ref = attn_ref * logits_ref
    hm_ref = jnp.einsum("bchw,kc->bkhw", xq, wq)

    tol = dict(atol=5e-3, rtol=5e-3)
    assert jnp.allclose(logits_l, logits_ref, **tol)
    assert jnp.allclose(logits_l2, logits_ref, **tol)
    assert jnp.allclose(hm_l, hm_ref, **tol)
    assert jnp.allclose(hm_l2, hm_ref, **tol)
    assert jnp.allclose(attn_s, attn_ref, **tol)
    assert jnp.allclose(attn_s2, attn_ref, **tol)
    assert jnp.allclose(scn_s, scn_ref, **tol)
    assert jnp.allclose(scn_s2, scn_ref, **tol)
    assert jnp.allclose(logits_b, logits_ref, **tol)
    assert jnp.allclose(logits_b2, logits_ref, **tol)

    print("KERNEL_OK")
</pallas_src>

<mosaic_0001>
module attributes {stable_mosaic.version = 11 : i64} {
  func.func @_cam_kernel_hwc(%arg0: i32, %arg1: memref<1x49x2048xbf16, #tpu.memory_space<vmem>>, %arg2: memref<2048x7xbf16, #tpu.memory_space<vmem>>, %arg3: memref<1x7xf32, #tpu.memory_space<vmem>>, %arg4: memref<1x1x7xf32, #tpu.memory_space<vmem>>, %arg5: memref<1x49x7xf32, #tpu.memory_space<vmem>>) attributes {dimension_semantics = [#tpu.dimension_semantics<parallel>], iteration_bounds = array<i64: 2>, scalar_prefetch = 0 : i64, scratch_operands = 0 : i64, tpu.core_type = #tpu.core_type<tc>, window_params = [{transform_indices = @transform_0, window_bounds = array<i64: 1, 49, 2048>}, {pipeline_mode = #tpu.pipeline_mode<synchronous>, transform_indices = @transform_1, window_bounds = array<i64: 2048, 7>}, {pipeline_mode = #tpu.pipeline_mode<synchronous>, transform_indices = @transform_2, window_bounds = array<i64: 1, 7>}, {transform_indices = @transform_3, window_bounds = array<i64: 1, 1, 7>}, {transform_indices = @transform_4, window_bounds = array<i64: 1, 49, 7>}]} {
    %c0 = arith.constant 0 : index
    %c0_0 = arith.constant 0 : index
    %c0_1 = arith.constant 0 : index
    %0 = vector.load %arg1[%c0, %c0_0, %c0_1] : memref<1x49x2048xbf16, #tpu.memory_space<vmem>>, vector<1x49x2048xbf16>
    %1 = vector.shape_cast %0 : vector<1x49x2048xbf16> to vector<49x2048xbf16>
    %c0_2 = arith.constant 0 : index
    %c0_3 = arith.constant 0 : index
    %2 = vector.load %arg2[%c0_2, %c0_3] : memref<2048x7xbf16, #tpu.memory_space<vmem>>, vector<2048x7xbf16>
    %cst = arith.constant dense<0.000000e+00> : vector<49x7xf32>
    %3 = tpu.matmul %1, %2, %cst {dimension_numbers = #tpu.dot_dimension_numbers<[1], [0], [0], [1], [0, 0, 1, 1], [], []>} : vector<49x2048xbf16>, vector<2048x7xbf16>, vector<49x7xf32> -> vector<49x7xf32>
    %c0_4 = arith.constant 0 : index
    %c0_5 = arith.constant 0 : index
    %c0_6 = arith.constant 0 : index
    %4 = vector.load %arg5[%c0_4, %c0_5, %c0_6] : memref<1x49x7xf32, #tpu.memory_space<vmem>>, vector<1x49x7xf32>
    %5 = vector.shape_cast %4 : vector<1x49x7xf32> to vector<49x7xf32>
    %6 = vector.shape_cast %3 : vector<49x7xf32> to vector<1x49x7xf32>
    tpu.vector_store %arg5[%c0_4, %c0_5, %c0_6], %6 {strides = array<i32>} : memref<1x49x7xf32, #tpu.memory_space<vmem>>, vector<1x49x7xf32>,
    %c0_7 = arith.constant 0 : index
    %c0_8 = arith.constant 0 : index
    %c0_9 = arith.constant 0 : index
    %7 = vector.load %arg5[%c0_7, %c0_8, %c0_9] : memref<1x49x7xf32, #tpu.memory_space<vmem>>, vector<1x49x7xf32>
    %cst_10 = arith.constant dense<0.000000e+00> : vector<1x7xf32>
    %8 = vector.multi_reduction <add>, %7, %cst_10 [1] : vector<1x49x7xf32> to vector<1x7xf32>
    %cst_11 = arith.constant 4.900000e+01 : f32
    %9 = vector.broadcast %cst_11 : f32 to vector<1x7xf32>
    %10 = arith.divf %8, %9 : vector<1x7xf32>
    %c0_12 = arith.constant 0 : index
    %c0_13 = arith.constant 0 : index
    %11 = vector.load %arg3[%c0_12, %c0_13] : memref<1x7xf32, #tpu.memory_space<vmem>>, vector<1x7xf32>
    %12 = arith.addf %10, %11 : vector<1x7xf32>
    %c0_14 = arith.constant 0 : index
    %c0_15 = arith.constant 0 : index
    %c0_16 = arith.constant 0 : index
    %13 = vector.load %arg4[%c0_14, %c0_15, %c0_16] : memref<1x1x7xf32, #tpu.memory_space<vmem>>, vector<1x1x7xf32>
    %14 = vector.shape_cast %13 : vector<1x1x7xf32> to vector<1x7xf32>
    %15 = vector.shape_cast %12 : vector<1x7xf32> to vector<1x1x7xf32>
    tpu.vector_store %arg4[%c0_14, %c0_15, %c0_16], %15 {strides = array<i32>} : memref<1x1x7xf32, #tpu.memory_space<vmem>>, vector<1x1x7xf32>,
    return
  }
  func.func @transform_0(%arg0: i32) -> (i32, i32, i32) {
    %c0_i32 = arith.constant 0 : i32
    %c0_i32_0 = arith.constant 0 : i32
    %c0_i32_1 = arith.constant 0 : i32
    return %arg0, %c0_i32, %c0_i32_0 : i32, i32, i32
  }
  func.func @transform_1(%arg0: i32) -> (i32, i32) {
    %c0_i32 = arith.constant 0 : i32
    %c0_i32_0 = arith.constant 0 : i32
    %c0_i32_1 = arith.constant 0 : i32
    return %c0_i32, %c0_i32_0 : i32, i32
  }
  func.func @transform_2(%arg0: i32) -> (i32, i32) {
    %c0_i32 = arith.constant 0 : i32
    %c0_i32_0 = arith.constant 0 : i32
    %c0_i32_1 = arith.constant 0 : i32
    return %c0_i32, %c0_i32_0 : i32, i32
  }
  func.func @transform_3(%arg0: i32) -> (i32, i32, i32) {
    %c0_i32 = arith.constant 0 : i32
    %c0_i32_0 = arith.constant 0 : i32
    %c0_i32_1 = arith.constant 0 : i32
    return %arg0, %c0_i32, %c0_i32_0 : i32, i32, i32
  }
  func.func @transform_4(%arg0: i32) -> (i32, i32, i32) {
    %c0_i32 = arith.constant 0 : i32
    %c0_i32_0 = arith.constant 0 : i32
    %c0_i32_1 = arith.constant 0 : i32
    return %arg0, %c0_i32, %c0_i32_0 : i32, i32, i32
  }
}

</mosaic_0001>

<bundles_post_ra>
// kernel: tpu_custom_call.1
= control target key start
LH: loop header
LB: loop body
LE: loop exit
PB: predicated region body
PF: predicated region fallthrough
CT: control target
= control target key end

     0   :  { %10 = vsyncpa [#allocation3], 0  ;;  %s3629_s0 = inlined_call_operand.vmem [shape: bf16[2,49,2048], index: 0, kind: input, shape index: {}]   ;;  %s3630_s1 = inlined_call_operand.vmem [shape: bf16[2048,7], index: 1, kind: input, shape index: {}]   ;;  %s3631_s2 = inlined_call_operand.vmem [shape: f32[1,7], index: 2, kind: input, shape index: {}]   ;;  %s3632_s3 = inlined_call_operand.hbm [shape: f32[2,1,7], index: 3, kind: output, shape index: {0}]   ;;  %s3633_s4 = inlined_call_operand.vmem [shape: f32[2,49,7], index: 4, kind: output, shape index: {1}]  }
   0x1   :  { %12 = vsyncpa [#allocation3 + $0x1], 0  ;;  %s3034_s15 = smov 0   ;;  %s3036_s16 = smov 0  }
   0x2   :  { %s3038_s17 = smov 0   ;;  %s3040_s18 = smov 0  }
   0x3 LB: > { %s3055_s19 = sadd.s32 4294967295, %s3006_s18   ;;  %s2238_s20 = sadd.s32 4294967294, %s3006_s18   ;;  %s3006_s18 = sphi %s3040_s18, %s3639_s18   ;;  %s3002_s17 = sphi %s3038_s17, %s3638_s17   ;;  %s2998_s16 = sphi %s3036_s16, %s3637_s16   ;;  %s2994_s15 = sphi %s3034_s15, %s3636_s15  }
   0x4   : > { %s3059_s21 = sadd.s32 1, %s3006_s18   ;;  %s93_s22 = sadd.s32 1, %s3002_s17 }
   0x5   : > { %s90_s23 = ssub.s32 %s3006_s18, %s3059_s21  ;;  %p103_p0 = scmp.ne.s32.totalorder %s3002_s17, %s2998_s16 }
   0x6   : > { %p91_p1 = scmp.eq.s32.totalorder %s90_s23, 0  ;;  %p104_p2 = scmp.eq.s32.totalorder %s3055_s19, 1 }
   0x7   : > { %p109_p3 = scmp.ne.s32.totalorder %s2998_s16, %s2994_s15  ;;  %p110_p4 = scmp.eq.s32.totalorder %s2238_s20, 1 }
   0x8   : > { %s3070_s24 = scalar_select %p91_p1, %s3002_s17, %s93_s22  }
   0x9   : > { %p3072_p5 = por %p104_p2, %p103_p0  ;;  %p3076_p6 = por %p110_p4, %p109_p3 }
   0xa   : > { %p2241_p7 = scmp.ge.s32.totalorder %s3006_s18, 1  ;;  %p168_p8 = scmp.lt.s32.totalorder %s3006_s18, 3 }
   0xc   : > { %p169_p9 = pnand %p2241_p7, %p168_p8 }
   0xd   : > { %v2800_v0 = vld [vmem:[%s3630_s1 + $0x40] sm:$0xff] (!%p169_p9)   ;;  %v2804_v4 = vld [vmem:[%s3630_s1 + $0x48] sm:$0xff] (!%p169_p9)   ;;  %v2808_v8 = vld [vmem:[%s3630_s1 + $0x50] sm:$0xff] (!%p169_p9)   ;;  %p198_p10 = scmp.lt.s32.totalorder (!%p169_p9), %s3055_s19, 1  ;;  %vm2097_vm0 = vcmask (!%p169_p9), 56320   ;;  %vm2104_vm1 = vcmask (!%p169_p9), 49152  }
   0xe   : > { %172 = sbr.rel (%p169_p9) target bundleno = 427 (0x1ab), region = 32  ;;  %v2801_v1 = vld [vmem:[%s3630_s1 + $0xc0] sm:$0xff] (!%p169_p9)   ;;  %2439 = vmatprep.subr.bf16.mxu0 (!%p169_p9), %v2800_v0  ;;  %v2805_v5 = vld [vmem:[%s3630_s1 + $0xc8] sm:$0xff] (!%p169_p9)   ;;  %v2809_v9 = vld [vmem:[%s3630_s1 + $0xd0] sm:$0xff] (!%p169_p9)   ;;  %s2436_s5 = sshll.u32 (!%p169_p9), %s3055_s19, 4 }
   0xf   : > { %v2802_v2 = vld [vmem:[%s3630_s1] sm:$0xff] (!%p169_p9)   ;;  %2479 = vmatprep.subr.bf16.mxu1 (!%p169_p9), %v2801_v1  ;;  %v2806_v6 = vld [vmem:[%s3630_s1 + $0x8] sm:$0xff] (!%p169_p9)   ;;  %v2810_v10 = vld [vmem:[%s3630_s1 + $0x10] sm:$0xff] (!%p169_p9)   ;;  %s3586_s10 = scalar_lea.hbm (!%p169_p9), %s3632_s3, %s2436_s5 }
  0x10   : > { %v2803_v3 = vld [vmem:[%s3630_s1 + $0x80] sm:$0xff] (!%p169_p9)   ;;  %2440 = vmatpush3.bf16.msra.mxu0 (!%p169_p9), %v2802_v2  ;;  %v2807_v7 = vld [vmem:[%s3630_s1 + $0x88] sm:$0xff] (!%p169_p9)   ;;  %v2811_v11 = vld [vmem:[%s3630_s1 + $0x90] sm:$0xff] (!%p169_p9)  }
  0x11   : > { %2480 = vmatpush3.bf16.msra.mxu1 (!%p169_p9), %v2803_v3  ;;  %2441 = vmatprep.subr.bf16.mxu0 (!%p169_p9), %v2804_v4  ;;  %v2812_v12 = vld [vmem:[%s3630_s1 + $0x58] sm:$0xff] (!%p169_p9)   ;;  %v2816_v16 = vld [vmem:[%s3630_s1 + $0x60] sm:$0xff] (!%p169_p9)   ;;  %v2820_v20 = vld [vmem:[%s3630_s1 + $0x68] sm:$0xff] (!%p169_p9)  }
  0x12   : > { %2481 = vmatprep.subr.bf16.mxu1 (!%p169_p9), %v2805_v5  ;;  %v2813_v13 = vld [vmem:[%s3630_s1 + $0xd8] sm:$0xff] (!%p169_p9)   ;;  %v2817_v17 = vld [vmem:[%s3630_s1 + $0xe0] sm:$0xff] (!%p169_p9)   ;;  %v2821_v21 = vld [vmem:[%s3630_s1 + $0xe8] sm:$0xff] (!%p169_p9)  }
  0x13   : > { %v2814_v14 = vld [vmem:[%s3630_s1 + $0x18] sm:$0xff] (!%p169_p9)   ;;  %v2818_v18 = vld [vmem:[%s3630_s1 + $0x20] sm:$0xff] (!%p169_p9)   ;;  %v2822_v22 = vld [vmem:[%s3630_s1 + $0x28] sm:$0xff] (!%p169_p9)  }
  0x14   : > { %2442 = vmatpush3.bf16.msra.mxu0 (!%p169_p9), %v2806_v6  ;;  %v2815_v15 = vld [vmem:[%s3630_s1 + $0x98] sm:$0xff] (!%p169_p9)   ;;  %v2819_v19 = vld [vmem:[%s3630_s1 + $0xa0] sm:$0xff] (!%p169_p9)   ;;  %v2823_v23 = vld [vmem:[%s3630_s1 + $0xa8] sm:$0xff] (!%p169_p9)  }
  0x15   : > { %2482 = vmatpush3.bf16.msra.mxu1 %v2807_v7  ;;  %2443 = vmatprep.subr.bf16.mxu0 %v2808_v8  ;;  %s3150_s11 = scalar_select %p198_p10, %s3055_s19, 1  ;;  %v2824_v24 = vld [vmem:[%s3630_s1 + $0x70] sm:$0xff]   ;;  %v2828_v28 = vld [vmem:[%s3630_s1 + $0x78] sm:$0xff]   ;;  %v2832_v40 = vld [vmem:[%s3630_s1 + $0x140] sm:$0xff]  }
  0x16   : > { %2483 = vmatprep.subr.bf16.mxu1 %v2809_v9  ;;  %v2825_v25 = vld [vmem:[%s3630_s1 + $0xf0] sm:$0xff]   ;;  %v2829_v29 = vld [vmem:[%s3630_s1 + $0xf8] sm:$0xff]   ;;  %v2833_v41 = vld [vmem:[%s3630_s1 + $0x1c0] sm:$0xff]   ;;  %s3008_s19 = smov [#allocation2]  }
  0x17   : > { %s2759_s29 = smul.u32 448, %s3150_s11  ;;  %v2826_v26 = vld [vmem:[%s3630_s1 + $0x30] sm:$0xff]   ;;  %v2830_v30 = vld [vmem:[%s3630_s1 + $0x38] sm:$0xff]   ;;  %v2834_v42 = vld [vmem:[%s3630_s1 + $0x100] sm:$0xff]   ;;  %s2948_s14 = sshll.u32 %s3008_s19, 4  ;;  %s2949_s14 = int_to_ptr.vmem [resolvable:$false] %s2948_s14 }
  0x18   : > { %2444 = vmatpush3.bf16.msra.mxu0 %v2810_v10  ;;  %v2827_v27 = vld [vmem:[%s3630_s1 + $0xb0] sm:$0xff]   ;;  %v2831_v31 = vld [vmem:[%s3630_s1 + $0xb8] sm:$0xff]   ;;  %v2835_v43 = vld [vmem:[%s3630_s1 + $0x180] sm:$0xff]   ;;  %s2950_s22 = scalar_lea.vmem %s2949_s14, 32 }
  0x19   : > { %2484 = vmatpush3.bf16.msra.mxu1 %v2811_v11  ;;  %2445 = vmatprep.subr.bf16.mxu0 %v2812_v12  ;;  %s3180_s20 = scalar_lea.vmem %s3629_s0, %s2759_s29  ;;  %v2836_v44 = vld [vmem:[%s3630_s1 + $0x148] sm:$0xff]   ;;  %v2840_v56 = vld [vmem:[%s3630_s1 + $0x150] sm:$0xff]   ;;  %v2844_v60 = vld [vmem:[%s3630_s1 + $0x158] sm:$0xff]  }
  0x1a   : > { %2485 = vmatprep.subr.bf16.mxu1 %v2813_v13  ;;  %v209_v32 = vld [vmem:[%s3180_s20] sm:$0xff]  ;;  %v210_v34 = vld [vmem:[%s3180_s20 + $0x8] sm:$0xff]  ;;  %v2841_v57 = vld [vmem:[%s3630_s1 + $0x1d0] sm:$0xff]  }
  0x1b   : > { %v217_v33 = vld [vmem:[%s3180_s20 + $0x40] sm:$0xff]  ;;  %v218_v37 = vld [vmem:[%s3180_s20 + $0x48] sm:$0xff]  ;;  %v2842_v58 = vld [vmem:[%s3630_s1 + $0x110] sm:$0xff]  }
  0x1c   : > { %2446 = vmatpush3.bf16.msra.mxu0 %v2814_v14  ;;  %v2244_v35 = vcombine.low %v209_v32, %v217_v33  ;;  %v2245_v36 = vcombine.high %v209_v32, %v217_v33  ;;  %v2246_v38 = vcombine.low %v210_v34, %v218_v37  ;;  %v2247_v39 = vcombine.high %v210_v34, %v218_v37  ;;  %v2837_v45 = vld [vmem:[%s3630_s1 + $0x1c8] sm:$0xff]   ;;  %v225_v48 = vld [vmem:[%s3180_s20 + $0x80] sm:$0xff]  ;;  %v2843_v59 = vld [vmem:[%s3630_s1 + $0x190] sm:$0xff]  }
  0x1d   : > { %2486 = vmatpush3.bf16.msra.mxu1 %v2815_v15  ;;  %2447 = vmatprep.subr.bf16.mxu0 %v2816_v16  ;;  %v2838_v46 = vld [vmem:[%s3630_s1 + $0x108] sm:$0xff]   ;;  %v233_v49 = vld [vmem:[%s3180_s20 + $0xc0] sm:$0xff]  ;;  %v2845_v61 = vld [vmem:[%s3630_s1 + $0x1d8] sm:$0xff]  }
  0x1e   : > { %2487 = vmatprep.subr.bf16.mxu1 %v2817_v17  ;;  %1617 = vmatprep.mubr.bf16.mxu0 %v2245_v36  ;;  %v2839_v47 = vld [vmem:[%s3630_s1 + $0x188] sm:$0xff]   ;;  %v2261_v50 = vcombine.high %v225_v48, %v233_v49  ;;  %v2260_v53 = vcombine.low %v225_v48, %v233_v49  ;;  %v2846_v62 = vld [vmem:[%s3630_s1 + $0x118] sm:$0xff]   ;;  %v241_v0 = vld [vmem:[%s3180_s20 + $0x100] sm:$0xff] }
  0x1f   : > { %1681 = vmatprep.mubr.bf16.mxu1 %v2247_v39  ;;  %v226_v51 = vld [vmem:[%s3180_s20 + $0x88] sm:$0xff]  ;;  %v2847_v63 = vld [vmem:[%s3630_s1 + $0x198] sm:$0xff]   ;;  %v249_v1 = vld [vmem:[%s3180_s20 + $0x140] sm:$0xff] }
  0x20   : > { %2448 = vmatpush3.bf16.msra.mxu0 %v2818_v18  ;;  %v234_v52 = vld [vmem:[%s3180_s20 + $0xc8] sm:$0xff]  ;;  %v2277_v4 = vcombine.high %v241_v0, %v249_v1  ;;  %v2276_v6 = vcombine.low %v241_v0, %v249_v1  ;;  %v2848_v8 = vld [vmem:[%s3630_s1 + $0x160] sm:$0xff]   ;;  %v212_v32 = vld [vmem:[%s3180_s20 + $0x18] sm:$0xff] }
  0x21   : > { %2488 = vmatpush3.bf16.msra.mxu1 %v2819_v19  ;;  %2449 = vmatprep.subr.bf16.mxu0 %v2820_v20  ;;  %v2263_v54 = vcombine.high %v226_v51, %v234_v52  ;;  %v2262_v55 = vcombine.low %v226_v51, %v234_v52  ;;  %v242_v2 = vld [vmem:[%s3180_s20 + $0x108] sm:$0xff]  ;;  %v2849_v9 = vld [vmem:[%s3630_s1 + $0x1e0] sm:$0xff]   ;;  %v220_v33 = vld [vmem:[%s3180_s20 + $0x58] sm:$0xff] }
  0x22   : > { %2489 = vmatprep.subr.bf16.mxu1 %v2821_v21  ;;  %v250_v3 = vld [vmem:[%s3180_s20 + $0x148] sm:$0xff]  ;;  %v2850_v10 = vld [vmem:[%s3630_s1 + $0x120] sm:$0xff]   ;;  %v2860_v21 = vld [vmem:[%s3630_s1 + $0x170] sm:$0xff]   ;;  %v2250_v36 = vcombine.low %v212_v32, %v220_v33 }
  0x23   : > { %v2279_v5 = vcombine.high %v242_v2, %v250_v3  ;;  %v2278_v7 = vcombine.low %v242_v2, %v250_v3  ;;  %v2851_v11 = vld [vmem:[%s3630_s1 + $0x1a0] sm:$0xff]   ;;  %v2852_v12 = vld [vmem:[%s3630_s1 + $0x168] sm:$0xff]   ;;  %v228_v48 = vld [vmem:[%s3180_s20 + $0x98] sm:$0xff] }
  0x24   : > { %2450 = vmatpush3.bf16.msra.mxu0 %v2822_v22  ;;  %v2853_v13 = vld [vmem:[%s3630_s1 + $0x1e8] sm:$0xff]   ;;  %v257_v16 = vld [vmem:[%s3180_s20 + $0x180] sm:$0x11]  ;;  %v244_v1 = vld [vmem:[%s3180_s20 + $0x118] sm:$0xff] }
  0x25   : > { %2490 = vmatpush3.bf16.msra.mxu1 %v2823_v23  ;;  %2451 = vmatprep.subr.bf16.mxu0 %v2824_v24  ;;  %v2854_v14 = vld [vmem:[%s3630_s1 + $0x128] sm:$0xff]   ;;  %v2293_v18 = vcombine.high %v257_v16, %v257_v16  ;;  %v2292_v20 = vcombine.low %v257_v16, %v257_v16  ;;  %v2861_v23 = vld [vmem:[%s3630_s1 + $0x1f0] sm:$0xff]   ;;  %v2868_v37 = vld [vmem:[%s3630_s1 + $0x240] sm:$0xff]  }
  0x26   : > { %2491 = vmatprep.subr.bf16.mxu1 %v2825_v25  ;;  %v2855_v15 = vld [vmem:[%s3630_s1 + $0x1a8] sm:$0xff]   ;;  %v2862_v24 = vld [vmem:[%s3630_s1 + $0x130] sm:$0xff]   ;;  %v2869_v39 = vld [vmem:[%s3630_s1 + $0x2c0] sm:$0xff]  }
  0x27   : > { %v258_v17 = vld [vmem:[%s3180_s20 + $0x188] sm:$0x11]  ;;  %v2863_v25 = vld [vmem:[%s3630_s1 + $0x1b0] sm:$0xff]   ;;  %v252_v2 = vld [vmem:[%s3180_s20 + $0x158] sm:$0xff] }
  0x28   : > { %2452 = vmatpush3.bf16.msra.mxu0 %v2826_v26  ;;  %v2295_v19 = vcombine.high %v258_v17, %v258_v17  ;;  %v2294_v22 = vcombine.low %v258_v17, %v258_v17  ;;  %v2864_v26 = vld [vmem:[%s3630_s1 + $0x178] sm:$0xff]  }
  0x29   : > { %2492 = vmatpush3.bf16.msra.mxu1 %v2827_v27  ;;  %2453 = vmatprep.subr.bf16.mxu0 %v2828_v28  ;;  %v2865_v27 = vld [vmem:[%s3630_s1 + $0x1f8] sm:$0xff]  }
  0x2a   : > { %2493 = vmatprep.subr.bf16.mxu1 %v2829_v29  ;;  %v2866_v28 = vld [vmem:[%s3630_s1 + $0x138] sm:$0xff]  }
  0x2b   : > { %v2867_v29 = vld [vmem:[%s3630_s1 + $0x1b8] sm:$0xff]  }
  0x2c   : > { %2454 = vmatpush3.bf16.msra.mxu0 %v2830_v30  ;;  %v211_v30 = vld [vmem:[%s3180_s20 + $0x10] sm:$0xff]  ;;  %v260_v16 = vld [vmem:[%s3180_s20 + $0x198] sm:$0x11] }
  0x2d   : > { %2494 = vmatpush3.bf16.msra.mxu1 %v2831_v31  ;;  %2519 = vmatprep.subr.bf16.mxu0 %v2832_v40  ;;  %v219_v31 = vld [vmem:[%s3180_s20 + $0x50] sm:$0xff]  ;;  %v2870_v40 = vld [vmem:[%s3630_s1 + $0x200] sm:$0xff]  }
  0x2e   : > { %2559 = vmatprep.subr.bf16.mxu1 %v2833_v41  ;;  %v2248_v34 = vcombine.low %v211_v30, %v219_v31  ;;  %v2871_v41 = vld [vmem:[%s3630_s1 + $0x280] sm:$0xff]  }
  0x2f   : > { %1618 = vmatmul.mubr.bf16.vlgmr.msra.gmra.mrb[0].mxu0 %v2244_v35  ;;  %v2249_v35 = vcombine.high %v211_v30, %v219_v31 }
  0x30   : > { %1682 = vmatmul.mubr.bf16.vlgmr.msra.gmra.mrb[0].mxu1 %v2246_v38  ;;  %2520 = vmatpush3.bf16.msra.mxu0 %v2834_v42  ;;  %v2251_v38 = vcombine.high %v212_v32, %v220_v33  ;;  %v2872_v42 = vld [vmem:[%s3630_s1 + $0x248] sm:$0xff]  }
  0x31   : > { %2560 = vmatpush3.bf16.msra.mxu1 %v2835_v43  ;;  %2521 = vmatprep.subr.bf16.mxu0 %v2836_v44  ;;  %v2873_v43 = vld [vmem:[%s3630_s1 + $0x2c8] sm:$0xff]  }
  0x32   : > { %2561 = vmatprep.subr.bf16.mxu1 %v2837_v45  ;;  %1625 = vmatprep.mubr.bf16.mxu0 %v2261_v50  ;;  %v2874_v44 = vld [vmem:[%s3630_s1 + $0x208] sm:$0xff]   ;;  %v236_v50 = vld [vmem:[%s3180_s20 + $0xd8] sm:$0xff] }
  0x33   : > { %1689 = vmatprep.mubr.bf16.mxu1 %v2263_v54  ;;  %v2875_v45 = vld [vmem:[%s3630_s1 + $0x288] sm:$0xff]   ;;  %v2267_v52 = vcombine.high %v228_v48, %v236_v50  ;;  %v2876_v54 = vld [vmem:[%s3630_s1 + $0x250] sm:$0xff]  }
  0x34   : > { %2522 = vmatpush3.bf16.msra.mxu0 %v2838_v46  ;;  %v227_v46 = vld [vmem:[%s3180_s20 + $0x90] sm:$0xff]  ;;  %v214_v32 = vld [vmem:[%s3180_s20 + $0x28] sm:$0xff] }
  0x35   : > { %2562 = vmatpush3.bf16.msra.mxu1 %v2839_v47  ;;  %2523 = vmatprep.subr.bf16.mxu0 %v2840_v56  ;;  %v235_v47 = vld [vmem:[%s3180_s20 + $0xd0] sm:$0xff]  ;;  %v222_v33 = vld [vmem:[%s3180_s20 + $0x68] sm:$0xff] }
  0x36   : > { %2563 = vmatprep.subr.bf16.mxu1 %v2841_v57  ;;  %v2265_v49 = vcombine.high %v227_v46, %v235_v47  ;;  %v2264_v51 = vcombine.low %v227_v46, %v235_v47  ;;  %v2878_v56 = vld [vmem:[%s3630_s1 + $0x210] sm:$0xff]   ;;  %v230_v46 = vld [vmem:[%s3180_s20 + $0xa8] sm:$0xff] }
  0x37   : > { %1626 = vmatmul.mubr.bf16.gmra.mrb[4].mxu0 %v2260_v53  ;;  %v2266_v53 = vcombine.low %v228_v48, %v236_v50  ;;  %v2879_v57 = vld [vmem:[%s3630_s1 + $0x290] sm:$0xff]   ;;  %v238_v47 = vld [vmem:[%s3180_s20 + $0xe8] sm:$0xff] }
  0x38   : > { %1690 = vmatmul.mubr.bf16.gmra.mrb[4].mxu1 %v2262_v55  ;;  %2524 = vmatpush3.bf16.msra.mxu0 %v2842_v58  ;;  %v2877_v55 = vld [vmem:[%s3630_s1 + $0x2d0] sm:$0xff]   ;;  %v2880_v58 = vld [vmem:[%s3630_s1 + $0x258] sm:$0xff]  }
  0x39   : > { %2564 = vmatpush3.bf16.msra.mxu1 %v2843_v59  ;;  %2525 = vmatprep.subr.bf16.mxu0 %v2844_v60  ;;  %v2881_v59 = vld [vmem:[%s3630_s1 + $0x2d8] sm:$0xff]  }
  0x3a   : > { %2565 = vmatprep.subr.bf16.mxu1 %v2845_v61  ;;  %1633 = vmatprep.mubr.bf16.mxu0 %v2277_v4  ;;  %v2882_v60 = vld [vmem:[%s3630_s1 + $0x218] sm:$0xff]   ;;  %v2283_v4 = vcombine.high %v244_v1, %v252_v2 }
  0x3b   : > { %1697 = vmatprep.mubr.bf16.mxu1 %v2279_v5  ;;  %v2883_v61 = vld [vmem:[%s3630_s1 + $0x298] sm:$0xff]   ;;  %v2282_v5 = vcombine.low %v244_v1, %v252_v2 }
  0x3c   : > { %2526 = vmatpush3.bf16.msra.mxu0 %v2846_v62  ;;  %v243_v62 = vld [vmem:[%s3180_s20 + $0x110] sm:$0xff] }
  0x3d   : > { %2566 = vmatpush3.bf16.msra.mxu1 %v2847_v63  ;;  %2527 = vmatprep.subr.bf16.mxu0 %v2848_v8  ;;  %v251_v63 = vld [vmem:[%s3180_s20 + $0x150] sm:$0xff]  ;;  %v2886_v8 = vld [vmem:[%s3630_s1 + $0x220] sm:$0xff]  }
  0x3e   : > { %2567 = vmatprep.subr.bf16.mxu1 %v2849_v9  ;;  %v2281_v0 = vcombine.high %v243_v62, %v251_v63  ;;  %v2280_v3 = vcombine.low %v243_v62, %v251_v63  ;;  %v2887_v9 = vld [vmem:[%s3630_s1 + $0x2a0] sm:$0xff]   ;;  %v246_v62 = vld [vmem:[%s3180_s20 + $0x128] sm:$0xff] }
  0x3f   : > { %1634 = vmatmul.mubr.bf16.gmra.mrb[8].mxu0 %v2276_v6  ;;  %v2884_v6 = vld [vmem:[%s3630_s1 + $0x260] sm:$0xff]  }
  0x40   : > { %1698 = vmatmul.mubr.bf16.gmra.mrb[8].mxu1 %v2278_v7  ;;  %2528 = vmatpush3.bf16.msra.mxu0 %v2850_v10  ;;  %v2885_v7 = vld [vmem:[%s3630_s1 + $0x2e0] sm:$0xff]   ;;  %v2888_v10 = vld [vmem:[%s3630_s1 + $0x268] sm:$0xff]  }
  0x41   : > { %2568 = vmatpush3.bf16.msra.mxu1 %v2851_v11  ;;  %2529 = vmatprep.subr.bf16.mxu0 %v2852_v12  ;;  %v2889_v11 = vld [vmem:[%s3630_s1 + $0x2e8] sm:$0xff]  }
  0x42   : > { %2569 = vmatprep.subr.bf16.mxu1 %v2853_v13  ;;  %1641 = vmatprep.mubr.bf16.mxu0 %v2293_v18  ;;  %v2890_v12 = vld [vmem:[%s3630_s1 + $0x228] sm:$0xff]   ;;  %v2299_v18 = vcombine.high %v260_v16, %v260_v16 }
  0x43   : > { %1705 = vmatprep.mubr.bf16.mxu1 %v2295_v19  ;;  %v2891_v13 = vld [vmem:[%s3630_s1 + $0x2a8] sm:$0xff]   ;;  %v2298_v19 = vcombine.low %v260_v16, %v260_v16 }
  0x44   : > { %2530 = vmatpush3.bf16.msra.mxu0 %v2854_v14  ;;  %v259_v14 = vld [vmem:[%s3180_s20 + $0x190] sm:$0x11] }
  0x45   : > { %2570 = vmatpush3.bf16.msra.mxu1 %v2855_v15  ;;  %2531 = vmatprep.subr.bf16.mxu0 %v2860_v21  ;;  %v2297_v15 = vcombine.high %v259_v14, %v259_v14  ;;  %v2296_v17 = vcombine.low %v259_v14, %v259_v14  ;;  %v2897_v21 = vld [vmem:[%s3630_s1 + $0x2f0] sm:$0xff]  }
  0x46   : > { %2571 = vmatprep.subr.bf16.mxu1 %v2861_v23  ;;  %v2899_v23 = vld [vmem:[%s3630_s1 + $0x2b0] sm:$0xff]  }
  0x47   : > { %1642 = vmatmul.mubr.bf16.gmra.mrb[12].mxu0 %v2292_v20  ;;  %v2896_v20 = vld [vmem:[%s3630_s1 + $0x270] sm:$0xff]  }
  0x48   : > { %1706 = vmatmul.mubr.bf16.gmra.mrb[12].mxu1 %v2294_v22  ;;  %2532 = vmatpush3.bf16.msra.mxu0 %v2862_v24  ;;  %v2898_v22 = vld [vmem:[%s3630_s1 + $0x230] sm:$0xff]   ;;  %v2900_v24 = vld [vmem:[%s3630_s1 + $0x278] sm:$0xff]  }
  0x49   : > { %2572 = vmatpush3.bf16.msra.mxu1 %v2863_v25  ;;  %2533 = vmatprep.subr.bf16.mxu0 %v2864_v26  ;;  %v2901_v25 = vld [vmem:[%s3630_s1 + $0x2f8] sm:$0xff]  }
  0x4a   : > { %2573 = vmatprep.subr.bf16.mxu1 %v2865_v27  ;;  %1745 = vmatprep.mubr.bf16.mxu0 %v2249_v35  ;;  %v2902_v26 = vld [vmem:[%s3630_s1 + $0x238] sm:$0xff]   ;;  %v2255_v35 = vcombine.high %v214_v32, %v222_v33 }
  0x4b   : > { %1809 = vmatprep.mubr.bf16.mxu1 %v2251_v38  ;;  %v2903_v27 = vld [vmem:[%s3630_s1 + $0x2b8] sm:$0xff]   ;;  %v2906_v38 = vld [vmem:[%s3630_s1 + $0x300] sm:$0xff]  }
  0x4c   : > { %2534 = vmatpush3.bf16.msra.mxu0 %v2866_v28  ;;  %v213_v28 = vld [vmem:[%s3180_s20 + $0x20] sm:$0xff] }
  0x4d   : > { %2574 = vmatpush3.bf16.msra.mxu1 %v2867_v29  ;;  %2599 = vmatprep.subr.bf16.mxu0 %v2868_v37  ;;  %v221_v29 = vld [vmem:[%s3180_s20 + $0x60] sm:$0xff] }
  0x4e   : > { %2639 = vmatprep.subr.bf16.mxu1 %v2869_v39  ;;  %v2252_v30 = vcombine.low %v213_v28, %v221_v29  ;;  %v2253_v31 = vcombine.high %v213_v28, %v221_v29  ;;  %v2905_v37 = vld [vmem:[%s3630_s1 + $0x3c0] sm:$0xff]   ;;  %v216_v28 = vld [vmem:[%s3180_s20 + $0x38] sm:$0xff] }
  0x4f   : > { %1746 = vmatmul.mubr.bf16.vlgmr.msra.gmra.mrb[16].mxu0 %v2248_v34  ;;  %v2254_v34 = vcombine.low %v214_v32, %v222_v33  ;;  %v2907_v39 = vld [vmem:[%s3630_s1 + $0x380] sm:$0xff]   ;;  %v231_v32 = vld [vmem:[%s3180_s20 + $0xb0] sm:$0xff] }
  0x50   : > { %1810 = vmatmul.mubr.bf16.vlgmr.msra.gmra.mrb[16].mxu1 %v2250_v36  ;;  %2600 = vmatpush3.bf16.msra.mxu0 %v2870_v40  ;;  %v2904_v36 = vld [vmem:[%s3630_s1 + $0x340] sm:$0xff]   ;;  %v2908_v40 = vld [vmem:[%s3630_s1 + $0x348] sm:$0xff]   ;;  %v239_v33 = vld [vmem:[%s3180_s20 + $0xf0] sm:$0xff] }
  0x51   : > { %2640 = vmatpush3.bf16.msra.mxu1 %v2871_v41  ;;  %2601 = vmatprep.subr.bf16.mxu0 %v2872_v42  ;;  %v2909_v41 = vld [vmem:[%s3630_s1 + $0x3c8] sm:$0xff]  }
  0x52   : > { %2641 = vmatprep.subr.bf16.mxu1 %v2873_v43  ;;  %1753 = vmatprep.mubr.bf16.mxu0 %v2265_v49  ;;  %v2910_v42 = vld [vmem:[%s3630_s1 + $0x308] sm:$0xff]   ;;  %v2271_v49 = vcombine.high %v230_v46, %v238_v47 }
  0x53   : > { %1817 = vmatprep.mubr.bf16.mxu1 %v2267_v52  ;;  %v2911_v43 = vld [vmem:[%s3630_s1 + $0x388] sm:$0xff]   ;;  %v2912_v52 = vld [vmem:[%s3630_s1 + $0x350] sm:$0xff]  }
  0x54   : > { %2602 = vmatpush3.bf16.msra.mxu0 %v2874_v44  ;;  %v229_v44 = vld [vmem:[%s3180_s20 + $0xa0] sm:$0xff] }
  0x55   : > { %2642 = vmatpush3.bf16.msra.mxu1 %v2875_v45  ;;  %2603 = vmatprep.subr.bf16.mxu0 %v2876_v54  ;;  %v237_v45 = vld [vmem:[%s3180_s20 + $0xe0] sm:$0xff]  ;;  %v2914_v54 = vld [vmem:[%s3630_s1 + $0x310] sm:$0xff]  }
  0x56   : > { %2643 = vmatprep.subr.bf16.mxu1 %v2877_v55  ;;  %v2269_v48 = vcombine.high %v229_v44, %v237_v45  ;;  %v2268_v50 = vcombine.low %v229_v44, %v237_v45  ;;  %v2915_v55 = vld [vmem:[%s3630_s1 + $0x390] sm:$0xff]   ;;  %v2272_v44 = vcombine.low %v231_v32, %v239_v33 }
  0x57   : > { %1754 = vmatmul.mubr.bf16.gmra.mrb[20].mxu0 %v2264_v51  ;;  %v2270_v51 = vcombine.low %v230_v46, %v238_v47 }
  0x58   : > { %1818 = vmatmul.mubr.bf16.gmra.mrb[20].mxu1 %v2266_v53  ;;  %2604 = vmatpush3.bf16.msra.mxu0 %v2878_v56  ;;  %v2913_v53 = vld [vmem:[%s3630_s1 + $0x3d0] sm:$0xff]   ;;  %v2916_v56 = vld [vmem:[%s3630_s1 + $0x358] sm:$0xff]  }
  0x59   : > { %2644 = vmatpush3.bf16.msra.mxu1 %v2879_v57  ;;  %2605 = vmatprep.subr.bf16.mxu0 %v2880_v58  ;;  %v2917_v57 = vld [vmem:[%s3630_s1 + $0x3d8] sm:$0xff]  }
  0x5a   : > { %2645 = vmatprep.subr.bf16.mxu1 %v2881_v59  ;;  %1761 = vmatprep.mubr.bf16.mxu0 %v2281_v0  ;;  %v2918_v58 = vld [vmem:[%s3630_s1 + $0x318] sm:$0xff]   ;;  %v254_v0 = vld [vmem:[%s3180_s20 + $0x168] sm:$0xff] }
  0x5b   : > { %1825 = vmatprep.mubr.bf16.mxu1 %v2283_v4  ;;  %v2919_v59 = vld [vmem:[%s3630_s1 + $0x398] sm:$0xff]   ;;  %v2287_v2 = vcombine.high %v246_v62, %v254_v0  ;;  %v2920_v4 = vld [vmem:[%s3630_s1 + $0x360] sm:$0xff]  }
  0x5c   : > { %2606 = vmatpush3.bf16.msra.mxu0 %v2882_v60  ;;  %v245_v60 = vld [vmem:[%s3180_s20 + $0x120] sm:$0xff] }
  0x5d   : > { %2646 = vmatpush3.bf16.msra.mxu1 %v2883_v61  ;;  %2607 = vmatprep.subr.bf16.mxu0 %v2884_v6  ;;  %v253_v61 = vld [vmem:[%s3180_s20 + $0x160] sm:$0xff] }
  0x5e   : > { %2647 = vmatprep.subr.bf16.mxu1 %v2885_v7  ;;  %v2285_v63 = vcombine.high %v245_v60, %v253_v61  ;;  %v2284_v1 = vcombine.low %v245_v60, %v253_v61  ;;  %v2922_v6 = vld [vmem:[%s3630_s1 + $0x320] sm:$0xff]  }
  0x5f   : > { %1762 = vmatmul.mubr.bf16.gmra.mrb[24].mxu0 %v2280_v3  ;;  %v2286_v3 = vcombine.low %v246_v62, %v254_v0  ;;  %v2923_v7 = vld [vmem:[%s3630_s1 + $0x3a0] sm:$0xff]  }
  0x60   : > { %1826 = vmatmul.mubr.bf16.gmra.mrb[24].mxu1 %v2282_v5  ;;  %2608 = vmatpush3.bf16.msra.mxu0 %v2886_v8  ;;  %v2921_v5 = vld [vmem:[%s3630_s1 + $0x3e0] sm:$0xff]   ;;  %v2924_v8 = vld [vmem:[%s3630_s1 + $0x368] sm:$0xff]  }
  0x61   : > { %2648 = vmatpush3.bf16.msra.mxu1 %v2887_v9  ;;  %2609 = vmatprep.subr.bf16.mxu0 %v2888_v10  ;;  %v2925_v9 = vld [vmem:[%s3630_s1 + $0x3e8] sm:$0xff]  }
  0x62   : > { %2649 = vmatprep.subr.bf16.mxu1 %v2889_v11  ;;  %1769 = vmatprep.mubr.bf16.mxu0 %v2297_v15  ;;  %v2926_v10 = vld [vmem:[%s3630_s1 + $0x328] sm:$0xff]  }
  0x63   : > { %1833 = vmatprep.mubr.bf16.mxu1 %v2299_v18  ;;  %v2927_v11 = vld [vmem:[%s3630_s1 + $0x3a8] sm:$0xff]   ;;  %v2932_v18 = vld [vmem:[%s3630_s1 + $0x370] sm:$0xff]  }
  0x64   : > { %2610 = vmatpush3.bf16.msra.mxu0 %v2890_v12  ;;  %v261_v12 = vld [vmem:[%s3180_s20 + $0x1a0] sm:$0x11] }
  0x65   : > { %2650 = vmatpush3.bf16.msra.mxu1 %v2891_v13  ;;  %2611 = vmatprep.subr.bf16.mxu0 %v2896_v20  ;;  %v262_v13 = vld [vmem:[%s3180_s20 + $0x1a8] sm:$0x11]  ;;  %v2301_v14 = vcombine.high %v261_v12, %v261_v12  ;;  %v2300_v16 = vcombine.low %v261_v12, %v261_v12  ;;  %v2934_v20 = vld [vmem:[%s3630_s1 + $0x330] sm:$0xff]  }
  0x66   : > { %2651 = vmatprep.subr.bf16.mxu1 %v2897_v21  ;;  %v2303_v15 = vcombine.high %v262_v13, %v262_v13  ;;  %v2935_v21 = vld [vmem:[%s3630_s1 + $0x3b0] sm:$0xff]  }
  0x67   : > { %1770 = vmatmul.mubr.bf16.gmra.mrb[28].mxu0 %v2296_v17  ;;  %v2302_v17 = vcombine.low %v262_v13, %v262_v13 }
  0x68   : > { %1834 = vmatmul.mubr.bf16.gmra.mrb[28].mxu1 %v2298_v19  ;;  %2612 = vmatpush3.bf16.msra.mxu0 %v2898_v22  ;;  %v2933_v19 = vld [vmem:[%s3630_s1 + $0x3f0] sm:$0xff]   ;;  %v2936_v22 = vld [vmem:[%s3630_s1 + $0x378] sm:$0xff]  }
  0x69   : > { %2652 = vmatpush3.bf16.msra.mxu1 %v2899_v23  ;;  %2613 = vmatprep.subr.bf16.mxu0 %v2900_v24  ;;  %v2937_v23 = vld [vmem:[%s3630_s1 + $0x3f8] sm:$0xff]  }
  0x6a   : > { %2653 = vmatprep.subr.bf16.mxu1 %v2901_v25  ;;  %1873 = vmatprep.mubr.bf16.mxu0 %v2253_v31  ;;  %v2938_v24 = vld [vmem:[%s3630_s1 + $0x338] sm:$0xff]  }
  0x6b   : > { %1937 = vmatprep.mubr.bf16.mxu1 %v2255_v35  ;;  %v2939_v25 = vld [vmem:[%s3630_s1 + $0x3b8] sm:$0xff]  }
  0x6c   : > { %2614 = vmatpush3.bf16.msra.mxu0 %v2902_v26  ;;  %v215_v26 = vld [vmem:[%s3180_s20 + $0x30] sm:$0xff]  ;;  %v224_v31 = vld [vmem:[%s3180_s20 + $0x78] sm:$0xff] }
  0x6d   : > { %2654 = vmatpush3.bf16.msra.mxu1 %v2903_v27  ;;  %2679 = vmatprep.subr.bf16.mxu0 %v2904_v36  ;;  %v223_v27 = vld [vmem:[%s3180_s20 + $0x70] sm:$0xff]  ;;  %v2259_v35 = vcombine.high %v216_v28, %v224_v31  ;;  %v2273_v36 = vcombine.high %v231_v32, %v239_v33 }
  0x6e   : > { %2719 = vmatprep.subr.bf16.mxu1 %v2905_v37  ;;  %v2256_v29 = vcombine.low %v215_v26, %v223_v27  ;;  %v232_v37 = vld [vmem:[%s3180_s20 + $0xb8] sm:$0xff] }
  0x6f   : > { %1874 = vmatmul.mubr.bf16.vlgmr.msra.gmra.mrb[32].mxu0 %v2252_v30  ;;  %v2257_v30 = vcombine.high %v215_v26, %v223_v27 }
  0x70   : > { %1938 = vmatmul.mubr.bf16.vlgmr.msra.gmra.mrb[32].mxu1 %v2254_v34  ;;  %2680 = vmatpush3.bf16.msra.mxu0 %v2906_v38  ;;  %v2258_v34 = vcombine.low %v216_v28, %v224_v31  ;;  %v240_v38 = vld [vmem:[%s3180_s20 + $0xf8] sm:$0xff] }
  0x71   : > { %2720 = vmatpush3.bf16.msra.mxu1 %v2907_v39  ;;  %2681 = vmatprep.subr.bf16.mxu0 %v2908_v40  ;;  %v2275_v39 = vcombine.high %v232_v37, %v240_v38  ;;  %v247_v40 = vld [vmem:[%s3180_s20 + $0x130] sm:$0xff]  ;;  %v2274_v45 = vcombine.low %v232_v37, %v240_v38 }
  0x72   : > { %2721 = vmatprep.subr.bf16.mxu1 %v2909_v41  ;;  %1881 = vmatprep.mubr.bf16.mxu0 %v2269_v48  ;;  %v255_v41 = vld [vmem:[%s3180_s20 + $0x170] sm:$0xff] }
  0x73   : > { %1945 = vmatprep.mubr.bf16.mxu1 %v2271_v49  ;;  %v2289_v46 = vcombine.high %v247_v40, %v255_v41  ;;  %v263_v48 = vld [vmem:[%s3180_s20 + $0x1b0] sm:$0x11]  ;;  %v264_v49 = vld [vmem:[%s3180_s20 + $0x1b8] sm:$0x11] }
  0x74   : > { %2682 = vmatpush3.bf16.msra.mxu0 %v2910_v42  ;;  %v248_v42 = vld [vmem:[%s3180_s20 + $0x138] sm:$0xff] }
  0x75   : > { %2722 = vmatpush3.bf16.msra.mxu1 %v2911_v43  ;;  %2683 = vmatprep.subr.bf16.mxu0 %v2912_v52  ;;  %v256_v43 = vld [vmem:[%s3180_s20 + $0x178] sm:$0xff]  ;;  %v2305_v52 = vcombine.high %v263_v48, %v263_v48  ;;  %s2760_s20 = smul.u32 56, %s3150_s11  ;;  %s189_s11 = sand.u32 1, %s2998_s16  }
  0x76   : > { %2723 = vmatprep.subr.bf16.mxu1 %v2913_v53  ;;  %v2291_v47 = vcombine.high %v248_v42, %v256_v43  ;;  %v2307_v53 = vcombine.high %v264_v49, %v264_v49  ;;  %s190_s6 = scalar_lea.vmem [#allocation2], %s189_s11  ;;  %s2138_s12 = scalar_lea.sflag [#allocation3], %s189_s11 }
  0x77   : > { %1882 = vmatmul.mubr.bf16.gmra.mrb[36].mxu0 %v2268_v50  ;;  %v2288_v50 = vcombine.low %v247_v40, %v255_v41  ;;  %s3544_s28 = scalar_lea.vmem %s3633_s4, %s2760_s20  ;;  %s2155_s7 = sshll.u32 %s190_s6, 4  ;;  %s3588_s7 = int_to_ptr.vmem [resolvable:$true] %s2155_s7 }
  0x78   : > { %1946 = vmatmul.mubr.bf16.gmra.mrb[36].mxu1 %v2270_v51  ;;  %2684 = vmatpush3.bf16.msra.mxu0 %v2914_v54  ;;  %v2290_v51 = vcombine.low %v248_v42, %v256_v43  ;;  %v2304_v54 = vcombine.low %v263_v48, %v263_v48  ;;  %s2944_s13 = scalar_lea.vmem %s3588_s7, 16  ;;  %p2951_p0 = scmp.lt.s32.totalorder %s3588_s7, %s2949_s14 }
  0x79   : > { %2724 = vmatpush3.bf16.msra.mxu1 %v2915_v55  ;;  %2685 = vmatprep.subr.bf16.mxu0 %v2916_v56  ;;  %v2306_v55 = vcombine.low %v264_v49, %v264_v49  ;;  %p2945_p11 = scmp.ne.s32.totalorder %s3588_s7, %s2944_s13  ;;  %p2952_p1 = scmp.lt.s32.totalorder %s2950_s22, %s2944_s13 }
  0x7a   : > { %2725 = vmatprep.subr.bf16.mxu1 %v2917_v57  ;;  %1889 = vmatprep.mubr.bf16.mxu0 %v2285_v63 }
  0x7b   : > { %1953 = vmatprep.mubr.bf16.mxu1 %v2287_v2  ;;  %p2946_p12 = pnand %p2945_p11, %p3072_p5  ;;  %p2953_p2 = por %p2952_p1, %p2951_p0 }
  0x7c   : > { %2686 = vmatpush3.bf16.msra.mxu0 %v2918_v58 }
  0x7d   : > { %2726 = vmatpush3.bf16.msra.mxu1 %v2919_v59  ;;  %2687 = vmatprep.subr.bf16.mxu0 %v2920_v4  ;;  %p2947_p13 = pneg %p2946_p12 }
  0x7e   : > { %2727 = vmatprep.subr.bf16.mxu1 %v2921_v5 }
  0x7f   : > { %1890 = vmatmul.mubr.bf16.gmra.mrb[40].mxu0 %v2284_v1  ;;  %p2954_p3 = pnand %p2953_p2, %p2947_p13 }
  0x80   : > { %1954 = vmatmul.mubr.bf16.gmra.mrb[40].mxu1 %v2286_v3  ;;  %2688 = vmatpush3.bf16.msra.mxu0 %v2922_v6 }
  0x81   : > { %2728 = vmatpush3.bf16.msra.mxu1 %v2923_v7  ;;  %2689 = vmatprep.subr.bf16.mxu0 %v2924_v8 }
  0x82   : > { %2729 = vmatprep.subr.bf16.mxu1 %v2925_v9  ;;  %1897 = vmatprep.mubr.bf16.mxu0 %v2301_v14 }
  0x83   : > { %1961 = vmatprep.mubr.bf16.mxu1 %v2303_v15 }
  0x84   : > { %2690 = vmatpush3.bf16.msra.mxu0 %v2926_v10 }
  0x85   : > { %2730 = vmatpush3.bf16.msra.mxu1 %v2927_v11  ;;  %2691 = vmatprep.subr.bf16.mxu0 %v2932_v18 }
  0x86   : > { %2731 = vmatprep.subr.bf16.mxu1 %v2933_v19 }
  0x87   : > { %1898 = vmatmul.mubr.bf16.gmra.mrb[44].mxu0 %v2300_v16 }
  0x88   : > { %1962 = vmatmul.mubr.bf16.gmra.mrb[44].mxu1 %v2302_v17  ;;  %2692 = vmatpush3.bf16.msra.mxu0 %v2934_v20 }
  0x89   : > { %2732 = vmatpush3.bf16.msra.mxu1 %v2935_v21  ;;  %2693 = vmatprep.subr.bf16.mxu0 %v2936_v22 }
  0x8a   : > { %2733 = vmatprep.subr.bf16.mxu1 %v2937_v23  ;;  %2001 = vmatprep.mubr.bf16.mxu0 %v2257_v30 }
  0x8b   : > { %2065 = vmatprep.mubr.bf16.mxu1 %v2259_v35 }
  0x8c   : > { %2694 = vmatpush3.bf16.msra.mxu0 %v2938_v24 }
  0x8d   : > { %2734 = vmatpush3.bf16.msra.mxu1 %v2939_v25 }
  0x8f   : > { %2002 = vmatmul.mubr.bf16.vlgmr.msra.gmra.mrb[48].mxu0 %v2256_v29 }
  0x90   : > { %2066 = vmatmul.mubr.bf16.vlgmr.msra.gmra.mrb[48].mxu1 %v2258_v34  ;;  %2009 = vmatprep.mubr.bf16.mxu0 %v2273_v36 }
  0x91   : > { %2073 = vmatprep.mubr.bf16.mxu1 %v2275_v39 }
  0x97   : > { %2010 = vmatmul.mubr.bf16.gmra.mrb[52].mxu0 %v2272_v44 }
  0x98   : > { %2074 = vmatmul.mubr.bf16.gmra.mrb[52].mxu1 %v2274_v45  ;;  %2017 = vmatprep.mubr.bf16.mxu0 %v2289_v46 }
  0x99   : > { %2081 = vmatprep.mubr.bf16.mxu1 %v2291_v47 }
  0x9f   : > { %2018 = vmatmul.mubr.bf16.gmra.mrb[56].mxu0 %v2288_v50 }
  0xa0   : > { %2082 = vmatmul.mubr.bf16.gmra.mrb[56].mxu1 %v2290_v51  ;;  %2025 = vmatprep.mubr.bf16.mxu0 %v2305_v52 }
  0xa1   : > { %2089 = vmatprep.mubr.bf16.mxu1 %v2307_v53 }
  0xa7   : > { %2026 = vmatmul.mubr.bf16.gmra.mrb[60].mxu0 %v2304_v54 }
  0xa8   : > { %2090 = vmatmul.mubr.bf16.gmra.mrb[60].mxu1 %v2306_v55 }
 0x102   : > { %v2455_v56 = vpop.f32.mrb[0].mxu0 }
 0x103   : > { %v2495_v57 = vpop.f32.mrb[0].mxu1  ;;  %v2456_v58 = vpop.f32.mrb[1].mxu0 }
 0x104   : > { %v2457_v59 = vadd.f32 %v2456_v58, %v2455_v56  ;;  %v2496_v60 = vpop.f32.mrb[1].mxu1  ;;  %v2458_v61 = vpop.f32.mrb[2].mxu0 }
 0x105   : > { %v2497_v62 = vadd.f32 %v2496_v60, %v2495_v57  ;;  %v2498_v63 = vpop.f32.mrb[2].mxu1  ;;  %v2459_v0 = vpop.f32.mrb[3].mxu0 }
 0x106   : > { %v2460_v1 = vadd.f32 %v2459_v0, %v2458_v61  ;;  %v2499_v2 = vpop.f32.mrb[3].mxu1 }
 0x107   : > { %v1684_v3 = vadd.f32 %v2497_v62, %v2457_v59  ;;  %v2500_v4 = vadd.f32 %v2499_v2, %v2498_v63 }
 0x109   : > { %v1687_v5 = vadd.f32 %v2500_v4, %v2460_v1 }
 0x10a   : > { %v2461_v6 = vpop.f32.mrb[4].mxu0 }
 0x10b   : > { %v2501_v7 = vpop.f32.mrb[4].mxu1  ;;  %v2462_v8 = vpop.f32.mrb[5].mxu0 }
 0x10c   : > { %v2463_v9 = vadd.f32 %v2462_v8, %v2461_v6  ;;  %v2502_v10 = vpop.f32.mrb[5].mxu1  ;;  %v2464_v11 = vpop.f32.mrb[6].mxu0 }
 0x10d   : > { %v2503_v12 = vadd.f32 %v2502_v10, %v2501_v7  ;;  %v2504_v13 = vpop.f32.mrb[6].mxu1  ;;  %v2465_v14 = vpop.f32.mrb[7].mxu0 }
 0x10e   : > { %v2466_v15 = vadd.f32 %v2465_v14, %v2464_v11  ;;  %v2505_v16 = vpop.f32.mrb[7].mxu1 }
 0x10f   : > { %v1692_v17 = vadd.f32 %v2503_v12, %v2463_v9  ;;  %v2506_v18 = vadd.f32 %v2505_v16, %v2504_v13 }
 0x111   : > { %v1695_v19 = vadd.f32 %v2506_v18, %v2466_v15 }
 0x112   : > { %v2467_v20 = vpop.f32.mrb[8].mxu0 }
 0x113   : > { %v2507_v21 = vpop.f32.mrb[8].mxu1  ;;  %v2468_v22 = vpop.f32.mrb[9].mxu0 }
 0x114   : > { %v2508_v23 = vpop.f32.mrb[9].mxu1  ;;  %v2469_v24 = vadd.f32 %v2468_v22, %v2467_v20  ;;  %v2470_v26 = vpop.f32.mrb[10].mxu0 }
 0x115   : > { %v2509_v25 = vadd.f32 %v2508_v23, %v2507_v21  ;;  %v2510_v27 = vpop.f32.mrb[10].mxu1  ;;  %v2471_v28 = vpop.f32.mrb[11].mxu0 }
 0x116   : > { %v2511_v29 = vpop.f32.mrb[11].mxu1  ;;  %v2472_v31 = vadd.f32 %v2471_v28, %v2470_v26 }
 0x117   : > { %v1700_v30 = vadd.f32 %v2509_v25, %v2469_v24  ;;  %v2512_v32 = vadd.f32 %v2511_v29, %v2510_v27 }
 0x119   : > { %v1703_v33 = vadd.f32 %v2512_v32, %v2472_v31 }
 0x11a   : > { %v2473_v34 = vpop.f32.mrb[12].mxu0 }
 0x11b   : > { %v2513_v35 = vpop.f32.mrb[12].mxu1  ;;  %v2474_v36 = vpop.f32.mrb[13].mxu0 }
 0x11c   : > { %v2514_v37 = vpop.f32.mrb[13].mxu1  ;;  %v2475_v38 = vadd.f32 %v2474_v36, %v2473_v34  ;;  %v2476_v40 = vpop.f32.mrb[14].mxu0 }
 0x11d   : > { %v2515_v39 = vadd.f32 %v2514_v37, %v2513_v35  ;;  %v2516_v41 = vpop.f32.mrb[14].mxu1  ;;  %v2477_v42 = vpop.f32.mrb[15].mxu0 }
 0x11e   : > { %v2517_v43 = vpop.f32.mrb[15].mxu1 }
 0x11f   : > { %v1708_v44 = vadd.f32 %v2515_v39, %v2475_v38 }
 0x122   : > { %v2535_v45 = vpop.f32.mrb[16].mxu0 }
 0x123   : > { %v2575_v46 = vpop.f32.mrb[16].mxu1  ;;  %v2536_v47 = vpop.f32.mrb[17].mxu0 }
 0x124   : > { %v2537_v48 = vadd.f32 %v2536_v47, %v2535_v45  ;;  %v2576_v49 = vpop.f32.mrb[17].mxu1  ;;  %v2538_v50 = vpop.f32.mrb[18].mxu0 }
 0x125   : > { %v2577_v51 = vadd.f32 %v2576_v49, %v2575_v46  ;;  %v2578_v52 = vpop.f32.mrb[18].mxu1  ;;  %v2539_v53 = vpop.f32.mrb[19].mxu0 }
 0x126   : > { %v1748_v54 = vadd.f32 %v2537_v48, %v1684_v3  ;;  %v2540_v55 = vadd.f32 %v2539_v53, %v2538_v50  ;;  %v2579_v56 = vpop.f32.mrb[19].mxu1 }
 0x127   : > { %v2580_v57 = vadd.f32 %v2579_v56, %v2578_v52 }
 0x128   : > { %v1812_v58 = vadd.f32 %v2577_v51, %v1748_v54  ;;  %v1751_v59 = vadd.f32 %v2540_v55, %v1687_v5 }
 0x12a   : > { %v1815_v60 = vadd.f32 %v2580_v57, %v1751_v59  ;;  %v2541_v61 = vpop.f32.mrb[20].mxu0 }
 0x12b   : > { %v2581_v62 = vpop.f32.mrb[20].mxu1  ;;  %v2542_v63 = vpop.f32.mrb[21].mxu0 }
 0x12c   : > { %v2543_v0 = vadd.f32 %v2542_v63, %v2541_v61  ;;  %v2582_v1 = vpop.f32.mrb[21].mxu1  ;;  %v2544_v2 = vpop.f32.mrb[22].mxu0 }
 0x12d   : > { %v2583_v4 = vadd.f32 %v2582_v1, %v2581_v62  ;;  %v2584_v6 = vpop.f32.mrb[22].mxu1  ;;  %v2545_v7 = vpop.f32.mrb[23].mxu0 }
 0x12e   : > { %v1756_v8 = vadd.f32 %v2543_v0, %v1692_v17  ;;  %v2546_v9 = vadd.f32 %v2545_v7, %v2544_v2  ;;  %v2585_v10 = vpop.f32.mrb[23].mxu1 }
 0x12f   : > { %v2586_v11 = vadd.f32 %v2585_v10, %v2584_v6 }
 0x130   : > { %v1820_v3 = vadd.f32 %v2583_v4, %v1756_v8  ;;  %v1759_v12 = vadd.f32 %v2546_v9, %v1695_v19 }
 0x132   : > { %v1823_v13 = vadd.f32 %v2586_v11, %v1759_v12  ;;  %v2547_v14 = vpop.f32.mrb[24].mxu0 }
 0x133   : > { %v2587_v15 = vpop.f32.mrb[24].mxu1  ;;  %v2548_v5 = vpop.f32.mrb[25].mxu0 }
 0x134   : > { %v2549_v16 = vadd.f32 %v2548_v5, %v2547_v14  ;;  %v2588_v18 = vpop.f32.mrb[25].mxu1  ;;  %v2550_v20 = vpop.f32.mrb[26].mxu0 }
 0x135   : > { %v2589_v21 = vadd.f32 %v2588_v18, %v2587_v15  ;;  %v2590_v22 = vpop.f32.mrb[26].mxu1  ;;  %v2551_v23 = vpop.f32.mrb[27].mxu0 }
 0x136   : > { %v1764_v24 = vadd.f32 %v2549_v16, %v1700_v30  ;;  %v2552_v25 = vadd.f32 %v2551_v23, %v2550_v20  ;;  %v2591_v26 = vpop.f32.mrb[27].mxu1 }
 0x137   : > { %v2592_v27 = vadd.f32 %v2591_v26, %v2590_v22 }
 0x138   : > { %v1828_v17 = vadd.f32 %v2589_v21, %v1764_v24  ;;  %v1767_v28 = vadd.f32 %v2552_v25, %v1703_v33 }
 0x13a   : > { %v1831_v29 = vadd.f32 %v2592_v27, %v1767_v28  ;;  %v2553_v31 = vpop.f32.mrb[28].mxu0 }
 0x13b   : > { %v2593_v32 = vpop.f32.mrb[28].mxu1  ;;  %v2554_v19 = vpop.f32.mrb[29].mxu0 }
 0x13c   : > { %v2555_v34 = vadd.f32 %v2554_v19, %v2553_v31  ;;  %v2594_v35 = vpop.f32.mrb[29].mxu1  ;;  %v2556_v36 = vpop.f32.mrb[30].mxu0 }
 0x13d   : > { %v2595_v37 = vadd.f32 %v2594_v35, %v2593_v32  ;;  %v2596_v38 = vpop.f32.mrb[30].mxu1  ;;  %v2557_v39 = vpop.f32.mrb[31].mxu0 }
 0x13e   : > { %v1772_v40 = vadd.f32 %v2555_v34, %v1708_v44  ;;  %v2597_v41 = vpop.f32.mrb[31].mxu1 }
 0x140   : > { %v1836_v42 = vadd.f32 %v2595_v37, %v1772_v40 }
 0x142   : > { %v2615_v43 = vpop.f32.mrb[32].mxu0 }
 0x143   : > { %v2655_v30 = vpop.f32.mrb[32].mxu1  ;;  %v2616_v45 = vpop.f32.mrb[33].mxu0 }
 0x144   : > { %v2617_v46 = vadd.f32 %v2616_v45, %v2615_v43  ;;  %v2656_v47 = vpop.f32.mrb[33].mxu1  ;;  %v2618_v48 = vpop.f32.mrb[34].mxu0 }
 0x145   : > { %v2657_v33 = vadd.f32 %v2656_v47, %v2655_v30  ;;  %v2658_v49 = vpop.f32.mrb[34].mxu1  ;;  %v2619_v50 = vpop.f32.mrb[35].mxu0 }
 0x146   : > { %v1876_v51 = vadd.f32 %v2617_v46, %v1812_v58  ;;  %v2620_v52 = vadd.f32 %v2619_v50, %v2618_v48  ;;  %v2659_v53 = vpop.f32.mrb[35].mxu1 }
 0x147   : > { %v2660_v54 = vadd.f32 %v2659_v53, %v2658_v49 }
 0x148   : > { %v1940_v55 = vadd.f32 %v2657_v33, %v1876_v51  ;;  %v1879_v56 = vadd.f32 %v2620_v52, %v1815_v60 }
 0x14a   : > { %v1943_v57 = vadd.f32 %v2660_v54, %v1879_v56  ;;  %v2621_v59 = vpop.f32.mrb[36].mxu0 }
 0x14b   : > { %v2661_v44 = vpop.f32.mrb[36].mxu1  ;;  %v2622_v61 = vpop.f32.mrb[37].mxu0 }
 0x14c   : > { %v2662_v62 = vpop.f32.mrb[37].mxu1  ;;  %v2623_v63 = vadd.f32 %v2622_v61, %v2621_v59  ;;  %v2624_v1 = vpop.f32.mrb[38].mxu0 }
 0x14d   : > { %v2663_v0 = vadd.f32 %v2662_v62, %v2661_v44  ;;  %v2664_v2 = vpop.f32.mrb[38].mxu1  ;;  %v2625_v4 = vpop.f32.mrb[39].mxu0 }
 0x14e   : > { %v2665_v6 = vpop.f32.mrb[39].mxu1  ;;  %v1884_v7 = vadd.f32 %v2623_v63, %v1820_v3  ;;  %v2626_v8 = vadd.f32 %v2625_v4, %v2624_v1 }
 0x14f   : > { %v2666_v9 = vadd.f32 %v2665_v6, %v2664_v2 }
 0x150   : > { %v1948_v58 = vadd.f32 %v2663_v0, %v1884_v7  ;;  %v1887_v10 = vadd.f32 %v2626_v8, %v1823_v13 }
 0x152   : > { %v3532_v11 = vadd.f32 %v2666_v9, %v1887_v10  ;;  %v2627_v12 = vpop.f32.mrb[40].mxu0 }
 0x153   : > { %v2667_v60 = vpop.f32.mrb[40].mxu1  ;;  %v2628_v14 = vpop.f32.mrb[41].mxu0 }
 0x154   : > { %v2629_v15 = vadd.f32 %v2628_v14, %v2627_v12  ;;  %v2668_v5 = vpop.f32.mrb[41].mxu1  ;;  %v2630_v16 = vpop.f32.mrb[42].mxu0 }
 0x155   : > { %v2669_v18 = vadd.f32 %v2668_v5, %v2667_v60  ;;  %v2670_v20 = vpop.f32.mrb[42].mxu1  ;;  %v2631_v21 = vpop.f32.mrb[43].mxu0 }
 0x156   : > { %v1892_v22 = vadd.f32 %v2629_v15, %v1828_v17  ;;  %v2632_v23 = vadd.f32 %v2631_v21, %v2630_v16  ;;  %v2671_v24 = vpop.f32.mrb[43].mxu1 }
 0x157   : > { %v2672_v25 = vadd.f32 %v2671_v24, %v2670_v20 }
 0x158   : > { %v3534_v3 = vadd.f32 %v2669_v18, %v1892_v22  ;;  %v1895_v26 = vadd.f32 %v2632_v23, %v1831_v29 }
 0x15a   : > { %v3536_v27 = vadd.f32 %v2672_v25, %v1895_v26  ;;  %v2633_v13 = vpop.f32.mrb[44].mxu0 }
 0x15b   : > { %v2673_v28 = vpop.f32.mrb[44].mxu1  ;;  %v2634_v31 = vpop.f32.mrb[45].mxu0 }
 0x15c   : > { %v2674_v32 = vpop.f32.mrb[45].mxu1  ;;  %v2635_v19 = vadd.f32 %v2634_v31, %v2633_v13  ;;  %v2636_v35 = vpop.f32.mrb[46].mxu0 }
 0x15d   : > { %v2675_v34 = vadd.f32 %v2674_v32, %v2673_v28  ;;  %v2676_v36 = vpop.f32.mrb[46].mxu1  ;;  %v2637_v37 = vpop.f32.mrb[47].mxu0 }
 0x15e   : > { %v2677_v38 = vpop.f32.mrb[47].mxu1  ;;  %v1900_v17 = vadd.f32 %v2635_v19, %v1836_v42 }
 0x160   : > { %v3538_v39 = vadd.f32 %v2675_v34, %v1900_v17 }
 0x162   : > { %v2695_v40 = vpop.f32.mrb[48].mxu0 }
 0x163   : > { %v2735_v41 = vpop.f32.mrb[48].mxu1  ;;  %v2696_v43 = vpop.f32.mrb[49].mxu0 }
 0x164   : > { %v2697_v29 = vadd.f32 %v2696_v43, %v2695_v40  ;;  %v2736_v30 = vpop.f32.mrb[49].mxu1  ;;  %v2698_v45 = vpop.f32.mrb[50].mxu0 }
 0x165   : > { %v2737_v46 = vadd.f32 %v2736_v30, %v2735_v41  ;;  %v2738_v47 = vpop.f32.mrb[50].mxu1  ;;  %v2699_v48 = vpop.f32.mrb[51].mxu0 }
 0x166   : > { %v2004_v33 = vadd.f32 %v2697_v29, %v1940_v55  ;;  %v2700_v49 = vadd.f32 %v2699_v48, %v2698_v45  ;;  %v2739_v50 = vpop.f32.mrb[51].mxu1 }
 0x167   : > { %v2740_v42 = vadd.f32 %v2739_v50, %v2738_v47 }
 0x168   : > { %v2068_v51 = vadd.f32 %v2737_v46, %v2004_v33  ;;  %v2007_v52 = vadd.f32 %v2700_v49, %v1943_v57 }
 0x16a   : > { %2098 = vst.msk [vmem:[%s3544_s28] sm:$0xff] %vm2097_vm0, %v2068_v51  ;;  %v2071_v53 = vadd.f32 %v2740_v42, %v2007_v52  ;;  %v2701_v54 = vpop.f32.mrb[52].mxu0 }
 0x16b   : > { %v2741_v56 = vpop.f32.mrb[52].mxu1  ;;  %v2702_v55 = vpop.f32.mrb[53].mxu0 }
 0x16c   : > { %2099 = vst.msk [vmem:[%s3544_s28 + $0x8] sm:$0xff] %vm2097_vm0, %v2071_v53  ;;  %v2703_v59 = vadd.f32 %v2702_v55, %v2701_v54  ;;  %v2742_v44 = vpop.f32.mrb[53].mxu1  ;;  %v2704_v61 = vpop.f32.mrb[54].mxu0 }
 0x16d   : > { %v2743_v62 = vadd.f32 %v2742_v44, %v2741_v56  ;;  %v2744_v63 = vpop.f32.mrb[54].mxu1  ;;  %v2705_v0 = vpop.f32.mrb[55].mxu0 }
 0x16e   : > { %v2012_v1 = vadd.f32 %v2703_v59, %v1948_v58  ;;  %v2706_v2 = vadd.f32 %v2705_v0, %v2704_v61  ;;  %v2745_v4 = vpop.f32.mrb[55].mxu1 }
 0x16f   : > { %v2746_v57 = vadd.f32 %v2745_v4, %v2744_v63 }
 0x170   : > { %v2076_v6 = vadd.f32 %v2743_v62, %v2012_v1  ;;  %v2015_v7 = vadd.f32 %v2706_v2, %v3532_v11  ;;  %v2134_v62 = vld [vmem:[%s3631_s2] sm:$0x1] }
 0x171   : > { %v2106_v25 = vld [vmem:[%s3544_s28] sm:$0xff] }
 0x172   : > { %2100 = vst.msk [vmem:[%s3544_s28 + $0x10] sm:$0xff] %vm2097_vm0, %v2076_v6  ;;  %v2079_v8 = vadd.f32 %v2746_v57, %v2015_v7  ;;  %v2707_v9 = vpop.f32.mrb[56].mxu0 }
 0x173   : > { %v2747_v10 = vpop.f32.mrb[56].mxu1  ;;  %v2708_v12 = vpop.f32.mrb[57].mxu0  ;;  %v2107_v22 = vld [vmem:[%s3544_s28 + $0x8] sm:$0xff] }
 0x174   : > { %2101 = vst.msk [vmem:[%s3544_s28 + $0x18] sm:$0xff] %vm2097_vm0, %v2079_v8  ;;  %v2709_v60 = vadd.f32 %v2708_v12, %v2707_v9  ;;  %v2748_v58 = vpop.f32.mrb[57].mxu1  ;;  %v2710_v14 = vpop.f32.mrb[58].mxu0  ;;  %v2114_v31 = vsel %vm2097_vm0, %v2107_v22, 0.0 }
 0x175   : > { %v2749_v15 = vadd.f32 %v2748_v58, %v2747_v10  ;;  %v2750_v5 = vpop.f32.mrb[58].mxu1  ;;  %v2711_v16 = vpop.f32.mrb[59].mxu0 }
 0x176   : > { %v2020_v11 = vadd.f32 %v2709_v60, %v3534_v3  ;;  %v2712_v18 = vadd.f32 %v2711_v16, %v2710_v14  ;;  %v2751_v20 = vpop.f32.mrb[59].mxu1 }
 0x177   : > { %v2752_v21 = vadd.f32 %v2751_v20, %v2750_v5 }
 0x178   : > { %v2084_v23 = vadd.f32 %v2749_v15, %v2020_v11  ;;  %v2023_v24 = vadd.f32 %v2712_v18, %v3536_v27  ;;  %v2113_v27 = vsel %vm2097_vm0, %v2106_v25, 0.0 }
 0x179   : > { %v2108_v26 = vld [vmem:[%s3544_s28 + $0x10] sm:$0xff]  ;;  %v2115_v41 = vadd.f32 %v2114_v31, %v2113_v27 }
 0x17a   : > { %2102 = vst.msk [vmem:[%s3544_s28 + $0x20] sm:$0xff] %vm2097_vm0, %v2084_v23  ;;  %v2087_v13 = vadd.f32 %v2752_v21, %v2023_v24  ;;  %v2713_v28 = vpop.f32.mrb[60].mxu0  ;;  %v2116_v36 = vsel %vm2097_vm0, %v2108_v26, 0.0 }
 0x17b   : > { %v2753_v32 = vpop.f32.mrb[60].mxu1  ;;  %v2714_v19 = vpop.f32.mrb[61].mxu0  ;;  %v2109_v40 = vld [vmem:[%s3544_s28 + $0x18] sm:$0xff]  ;;  %v2117_v30 = vadd.f32 %v2116_v36, %v2115_v41 }
 0x17c   : > { %2103 = vst.msk [vmem:[%s3544_s28 + $0x28] sm:$0xff] %vm2097_vm0, %v2087_v13  ;;  %v2715_v3 = vadd.f32 %v2714_v19, %v2713_v28  ;;  %v2754_v34 = vpop.f32.mrb[61].mxu1  ;;  %v2716_v35 = vpop.f32.mrb[62].mxu0  ;;  %v2118_v46 = vsel %vm2097_vm0, %v2109_v40, 0.0 }
 0x17d   : > { %v2755_v37 = vadd.f32 %v2754_v34, %v2753_v32  ;;  %v2756_v38 = vpop.f32.mrb[62].mxu1  ;;  %v2717_v17 = vpop.f32.mrb[63].mxu0  ;;  %v2119_v49 = vadd.f32 %v2118_v46, %v2117_v30 }
 0x17e   : > { %v2028_v43 = vadd.f32 %v2715_v3, %v3538_v39  ;;  %v2757_v29 = vpop.f32.mrb[63].mxu1 }
 0x180   : > { %v2092_v45 = vadd.f32 %v2755_v37, %v2028_v43 }
 0x181   : > { %v2110_v47 = vld [vmem:[%s3544_s28 + $0x20] sm:$0xff] }
 0x182   : > { %2105 = vst.msk [vmem:[%s3544_s28 + $0x30] sm:$0x1] %vm2104_vm1, %v2092_v45  ;;  %v2120_v48 = vsel %vm2097_vm0, %v2110_v47, 0.0 }
 0x183   : > { %v2111_v33 = vld [vmem:[%s3544_s28 + $0x28] sm:$0xff]  ;;  %v2121_v50 = vadd.f32 %v2120_v48, %v2119_v49 }
 0x184   : > { %v2122_v42 = vsel %vm2097_vm0, %v2111_v33, 0.0 }
 0x185   : > { %v2123_v39 = vadd.f32 %v2122_v42, %v2121_v50 }
 0x189   : > { %v2112_v51 = vld [vmem:[%s3544_s28 + $0x30] sm:$0x1] }
 0x18a   : > { %v2124_v52 = vsel %vm2104_vm1, %v2112_v51, 0.0 }
 0x18b   : > { %v2125_v53 = vadd.f32 %v2124_v52, %v2123_v39 }
 0x18d   : > { %v2126_v54 = vrot.slane %v2125_v53, 4 }
 0x18f   : > { %v2127_v56 = vadd.f32 %v2126_v54, %v2125_v53 }
 0x191   : > { %v2128_v55 = vrot.slane %v2127_v56, 2 }
 0x193   : > { %v2129_v59 = vadd.f32 %v2128_v55, %v2127_v56 }
 0x195   : > { %v2130_v44 = vrot.slane %v2129_v59, 1 }
 0x197   : > { %v2131_v61 = vadd.f32 %v2130_v44, %v2129_v59 }
 0x199   : > { %v2133_v63 = vmul.f32 0.020408163, %v2131_v61 }
 0x19b   : > { %v2135_v0 = vadd.f32 %v2134_v62, %v2133_v63 }
 0x19d   : > { %2136 = vst.msk [vmem:[%s190_s6] sm:$0x1] %vm2104_vm1, %v2135_v0 }
 0x19e   : > { %2957 = shalt.err (!%p2954_p3)
}
 0x19f   : > { %s2958_s20 = scalar_lea.hbm %s3586_s10, 16  ;;  %s2962_s28 = scalar_lea.hbm %s3632_s3, 32 }
 0x1a0   : > { %p2959_p4 = scmp.ne.s32.totalorder %s3586_s10, %s2958_s20  ;;  %p2963_p9 = scmp.lt.u32.totalorder %s3586_s10, %s3632_s3 }
 0x1a1   : > { %p2964_p10 = scmp.lt.u32.totalorder %s2962_s28, %s2958_s20  ;;  %p2966_p12 = scmp.lt.u32.totalorder %s2958_s20, %s3586_s10 }
 0x1a2   : > { %p2960_p7 = pnand %p2959_p4, %p3072_p5 }
 0x1a3   : > { %p2965_p11 = por %p2964_p10, %p2963_p9 }
 0x1a4   : > { %p2961_p8 = pneg %p2960_p7 }
 0x1a5   : > { %p2967_p13 = por %p2966_p12, %p2965_p11 }
 0x1a7   : > { %p2968_p0 = pnand %p2967_p13, %p2961_p8 }
 0x1a9   : > { %2971 = shalt.err (!%p2968_p0)
}
 0x1aa   : > { %2761 = dma.vmem_to_hbm [thread:$0]  (%p3072_p5), %s3588_s7, 16, %s3586_s10, %s2138_s12  }
 0x1ab PF: > { %p2767_p1 = scmp.ge.s32.totalorder %s3006_s18, 2  ;;  %s2170_s30 = sand.u32 1, %s2994_s15  }
 0x1ac   : > { %s2171_s5 = scalar_lea.sflag [#allocation3], %s2170_s30 }
 0x1ad   : > { %p2764_p2 = pnand %p2767_p1, %p3076_p6 }
 0x1af   : > { %2989 = dma.done.wait (!%p2764_p2), %s2171_s5, 16  }
 0x1b0   : > { %2991 = vsyncadd (!%p2764_p2), %s2171_s5, 4294967280  ;;  %p15_p3 = scmp.ge.s32.totalorder %s3059_s21, 4   ;;  %s3636_s15 = smov %s2998_s16 }
 0x1b1   : > { %s3637_s16 = smov %s3002_s17  ;;  %s3638_s17 = smov %s3070_s24 }
 0x1b2   : > { %s3639_s18 = smov %s3059_s21  ;;  %17 = sbr.rel (!%p15_p3) target bundleno = 3 (0x3), region = 79 }
 0x1b9   :  { %2183 = vsyncpa [#allocation3], 1 }
 0x1ba   :  { %2185 = vsyncpa [#allocation3 + $0x1], 1 }

</bundles_post_ra>
